<compile_context>
chip_gen: v6e
topology: v6e:2x2x1
jax: 0.10.0
libtpu: 0.0.40
codegen_flags: <defaults>
</compile_context>

<pallas_src>
import functools

import jax
import jax.numpy as jnp
from jax import lax
from jax.experimental import pallas as pl
from jax.experimental.pallas import tpu as pltpu


def _round_up(x, m):
    return (x + m - 1) // m * m


def _fused_conv_in_relu_kernel(taps_ref, w_ref, o_ref, sum_ref, sq_ref, *, inv_p, eps, p_tile):
    # taps_ref: (9C, Pt) bf16        w_ref: (Ct, 9C) bf16
    # o_ref:    (Ct, Pp) out dtype   -- VMEM-resident across the spatial ("arbitrary") axis
    # sum_ref / sq_ref: (Ct, 1) f32  -- streamed per-(sample, channel) stats, VMEM scratch
    p = pl.program_id(2)

    @pl.when(p == 0)
    def _init():
        sum_ref[...] = jnp.zeros_like(sum_ref)
        sq_ref[...] = jnp.zeros_like(sq_ref)

    # One K = 9C matmul, f32 accumulation inside the MXU. Channels-major result (Ct, Pt)
    # means the final output is already NCHW -- no transpose pass anywhere.
    acc = jnp.dot(w_ref[...], taps_ref[...], preferred_element_type=jnp.float32)

    if p_tile == o_ref.shape[1]:           # single spatial tile: full, lane-dense store
        o_ref[...] = acc.astype(o_ref.dtype)
    else:                                  # multi-tile: aligned dynamic lane-offset store
        off = pl.multiple_of(p * p_tile, p_tile)
        o_ref[:, pl.ds(off, p_tile)] = acc.astype(o_ref.dtype)

    sum_ref[...] += jnp.sum(acc, axis=1, keepdims=True)
    sq_ref[...] += jnp.sum(acc * acc, axis=1, keepdims=True)

    @pl.when(p == pl.num_programs(2) - 1)
    def _finalize():
        mean = sum_ref[...] * inv_p                                   # (Ct, 1)
        var = jnp.maximum(sq_ref[...] * inv_p - mean * mean, 0.0)     # one-pass E[x^2]-mean^2
        inv_std = lax.rsqrt(var + eps)
        y = o_ref[...].astype(jnp.float32)
        o_ref[...] = jnp.maximum((y - mean) * inv_std, 0.0).astype(o_ref.dtype)


def contracting_block(x, weight, bias=None, *, spatial_tile=None):
    """x: (N, C, H, W); weight: (2C, C, 3, 3); bias: (2C,) (ignored - InstanceNorm cancels it).
    Matches Conv2d(pad=1 reflect, stride=2) -> InstanceNorm2d -> ReLU. Returns NCHW."""
    del bias  # a per-channel conv bias is removed exactly by InstanceNorm2d(affine=False)

    N, C, H, W = x.shape
    Cout = weight.shape[0]
    Ho = (H - 1) // 2 + 1
    Wo = (W - 1) // 2 + 1
    P = Ho * Wo
    K = 9 * C

    Coutp = _round_up(Cout, 8)             # sublane-aligned output channels (usually == Cout)

    # ---- spatial (lane) tiling: single tile when it fits comfortably, else 1024-wide tiles ----
    if spatial_tile is not None:
        Pt = _round_up(spatial_tile, 128)
        Pp = _round_up(P, Pt)
    elif P < 128:
        Pt = Pp = P
    else:
        Pp = _round_up(P, 128)
        if Pp <= 2048:
            Pt = Pp
        else:
            Pt = 1024
            Pp = _round_up(P, Pt)
    n_p = Pp // Pt

    # ---- output-channel tiling: keep full Cout resident (taps streamed exactly once) unless
    # the per-(n, c) resident slab would blow the v7x (64 MiB) VMEM budget. ----
    slab_budget = 16 * 1024 * 1024
    Ct = Coutp
    while Ct % 16 == 0 and Ct * Pp * 4 > slab_budget:
        Ct //= 2
    if N == 1 and Coutp // Ct == 1 and Ct % 16 == 0:
        Ct //= 2                           # give the second TensorCore (v7x) a parallel block
    n_c = Coutp // Ct

    # ---- glue (plain JAX): reflect pad + channels-major im2col (N, 9C, P), k = c*9+kh*3+kw ----
    xp = jnp.pad(x, ((0, 0), (0, 0), (1, 1), (1, 1)), mode="reflect")
    patches = [
        xp[:, :, kh:kh + 2 * Ho:2, kw:kw + 2 * Wo:2].reshape(N, C, P)
        for kh in range(3) for kw in range(3)
    ]
    taps = jnp.stack(patches, axis=2).reshape(N, K, P)
    if Pp != P:
        taps = jnp.pad(taps, ((0, 0), (0, 0), (0, Pp - P)))   # zero columns: inert in stats
    taps = taps.astype(jnp.bfloat16)
    # TODO(synk): building the 9 taps in-kernel from a reflect-padded NHWC row slab would cut
    # this wrapper-side im2col materialization; kept as XLA glue for robustness.

    w2 = weight.reshape(Cout, K)                               # same k ordering as the taps
    if Coutp != Cout:
        w2 = jnp.pad(w2, ((0, Coutp - Cout), (0, 0)))
    w2 = w2.astype(jnp.bfloat16)

    out_nc = pl.pallas_call(
        functools.partial(_fused_conv_in_relu_kernel, inv_p=1.0 / P, eps=1e-5, p_tile=Pt),
        out_shape=jax.ShapeDtypeStruct((N, Coutp, Pp), x.dtype),
        grid=(N, n_c, n_p),
        in_specs=[
            pl.BlockSpec((None, K, Pt), lambda n, c, p: (n, 0, p)),   # taps
            pl.BlockSpec((Ct, K), lambda n, c, p: (c, 0)),            # weights (stay resident)
        ],
        out_specs=pl.BlockSpec((None, Ct, Pp), lambda n, c, p: (n, c, 0)),
        scratch_shapes=[
            pltpu.VMEM((Ct, 1), jnp.float32),   # per-channel sum
            pltpu.VMEM((Ct, 1), jnp.float32),   # per-channel sum of squares
        ],
        compiler_params=pltpu.CompilerParams(
            dimension_semantics=("parallel", "parallel", "arbitrary"),
            vmem_limit_bytes=48 * 1024 * 1024,
        ),
    )(taps, w2)

    # Output is already NCHW; slices are no-ops when Coutp==Cout and Pp==P (the common case).
    return out_nc[:, :Cout, :P].reshape(N, Cout, Ho, Wo)


def reference_block(x, weight, bias):
    """Pure-JAX reference matching the PyTorch module semantics (bias included)."""
    xp = jnp.pad(x, ((0, 0), (0, 0), (1, 1), (1, 1)), mode="reflect")
    y = lax.conv_general_dilated(
        xp, weight, window_strides=(2, 2), padding="VALID",
        dimension_numbers=("NCHW", "OIHW", "NCHW"),
    ) + bias[None, :, None, None]
    mean = jnp.mean(y, axis=(2, 3), keepdims=True)
    var = jnp.mean((y - mean) ** 2, axis=(2, 3), keepdims=True)
    y = (y - mean) * lax.rsqrt(var + 1e-5)
    return jnp.maximum(y, 0.0)


if __name__ == "__main__":
    key = jax.random.PRNGKey(0)
    k_x, k_w, k_b = jax.random.split(key, 3)

    # --- primary check: N=2, C=4, 16x16 (single spatial tile, no padding anywhere) ---
    N, C, H, W = 2, 4, 16, 16
    Cout = 2 * C
    x = jax.random.normal(k_x, (N, C, H, W), dtype=jnp.float32)
    fan_in = C * 3 * 3
    weight = jax.random.normal(k_w, (Cout, C, 3, 3), dtype=jnp.float32) / jnp.sqrt(fan_in)
    bias = jax.random.normal(k_b, (Cout,), dtype=jnp.float32) * 0.1

    fwd = jax.jit(contracting_block)
    out = jax.block_until_ready(fwd(x, weight, bias))
    ref = jax.block_until_ready(reference_block(x, weight, bias))
    assert out.shape == (N, Cout, H // 2, W // 2), out.shape
    err = float(jnp.max(jnp.abs(out - ref)))
    assert jnp.allclose(out, ref, atol=5e-2, rtol=5e-2), err  # bf16 MXU inputs, f32 accum

    # --- secondary check: exercises multi-tile spatial streaming, padded P and the
    #     dynamic-offset resident-slab store path (N=1, 40x40, forced 128-wide tiles) ---
    x2 = jax.random.normal(k_x, (1, C, 40, 40), dtype=jnp.float32)
    fwd2 = jax.jit(functools.partial(contracting_block, spatial_tile=128))
    out2 = jax.block_until_ready(fwd2(x2, weight, bias))
    ref2 = jax.block_until_ready(reference_block(x2, weight, bias))
    assert out2.shape == (1, Cout, 20, 20), out2.shape
    err2 = float(jnp.max(jnp.abs(out2 - ref2)))
    assert jnp.allclose(out2, ref2, atol=5e-2, rtol=5e-2), err2

    print("KERNEL_OK")
</pallas_src>

<mosaic_0001>
module attributes {stable_mosaic.version = 11 : i64} {
  func.func @_fused_conv_in_relu_kernel(%arg0: i32, %arg1: i32, %arg2: i32, %arg3: memref<1x36x64xbf16, #tpu.memory_space<vmem>>, %arg4: memref<8x36xbf16, #tpu.memory_space<vmem>>, %arg5: memref<1x8x64xf32, #tpu.memory_space<vmem>>, %arg6: memref<8x1xf32, #tpu.memory_space<vmem>>, %arg7: memref<8x1xf32, #tpu.memory_space<vmem>>) attributes {dimension_semantics = [#tpu.dimension_semantics<parallel>, #tpu.dimension_semantics<parallel>, #tpu.dimension_semantics<arbitrary>], iteration_bounds = array<i64: 2, 1, 1>, scalar_prefetch = 0 : i64, scratch_operands = 2 : i64, tpu.core_type = #tpu.core_type<tc>, window_params = [{transform_indices = @transform_0, window_bounds = array<i64: 1, 36, 64>}, {transform_indices = @transform_1, window_bounds = array<i64: 8, 36>}, {transform_indices = @transform_2, window_bounds = array<i64: 1, 8, 64>}]} {
    %c0_i32 = arith.constant 0 : i32
    %0 = arith.cmpi eq, %arg2, %c0_i32 : i32
    %1 = arith.extui %0 : i1 to i32
    %c0_i32_0 = arith.constant 0 : i32
    %2 = arith.cmpi ne, %1, %c0_i32_0 : i32
    scf.if %2 {
      %cst_20 = arith.constant 0.000000e+00 : f32
      %24 = vector.broadcast %cst_20 : f32 to vector<8x1xf32>
      %c0_21 = arith.constant 0 : index
      %c0_22 = arith.constant 0 : index
      %25 = vector.load %arg6[%c0_21, %c0_22] : memref<8x1xf32, #tpu.memory_space<vmem>>, vector<8x1xf32>
      tpu.vector_store %arg6[%c0_21, %c0_22], %24 {strides = array<i32>} : memref<8x1xf32, #tpu.memory_space<vmem>>, vector<8x1xf32>,
      %cst_23 = arith.constant 0.000000e+00 : f32
      %26 = vector.broadcast %cst_23 : f32 to vector<8x1xf32>
      %c0_24 = arith.constant 0 : index
      %c0_25 = arith.constant 0 : index
      %27 = vector.load %arg7[%c0_24, %c0_25] : memref<8x1xf32, #tpu.memory_space<vmem>>, vector<8x1xf32>
      tpu.vector_store %arg7[%c0_24, %c0_25], %26 {strides = array<i32>} : memref<8x1xf32, #tpu.memory_space<vmem>>, vector<8x1xf32>,
    } else {
    }
    %c0 = arith.constant 0 : index
    %c0_1 = arith.constant 0 : index
    %3 = vector.load %arg4[%c0, %c0_1] : memref<8x36xbf16, #tpu.memory_space<vmem>>, vector<8x36xbf16>
    %c0_2 = arith.constant 0 : index
    %c0_3 = arith.constant 0 : index
    %c0_4 = arith.constant 0 : index
    %4 = vector.load %arg3[%c0_2, %c0_3, %c0_4] : memref<1x36x64xbf16, #tpu.memory_space<vmem>>, vector<1x36x64xbf16>
    %5 = vector.shape_cast %4 : vector<1x36x64xbf16> to vector<36x64xbf16>
    %cst = arith.constant dense<0.000000e+00> : vector<8x64xf32>
    %6 = tpu.matmul %3, %5, %cst {dimension_numbers = #tpu.dot_dimension_numbers<[1], [0], [0], [1], [0, 0, 1, 1], [], []>} : vector<8x36xbf16>, vector<36x64xbf16>, vector<8x64xf32> -> vector<8x64xf32>
    %c0_5 = arith.constant 0 : index
    %c0_6 = arith.constant 0 : index
    %c0_7 = arith.constant 0 : index
    %7 = vector.load %arg5[%c0_5, %c0_6, %c0_7] : memref<1x8x64xf32, #tpu.memory_space<vmem>>, vector<1x8x64xf32>
    %8 = vector.shape_cast %7 : vector<1x8x64xf32> to vector<8x64xf32>
    %9 = vector.shape_cast %6 : vector<8x64xf32> to vector<1x8x64xf32>
    tpu.vector_store %arg5[%c0_5, %c0_6, %c0_7], %9 {strides = array<i32>} : memref<1x8x64xf32, #tpu.memory_space<vmem>>, vector<1x8x64xf32>,
    %c0_8 = arith.constant 0 : index
    %c0_9 = arith.constant 0 : index
    %10 = vector.load %arg6[%c0_8, %c0_9] : memref<8x1xf32, #tpu.memory_space<vmem>>, vector<8x1xf32>
    %cst_10 = arith.constant dense<0.000000e+00> : vector<8xf32>
    %11 = vector.multi_reduction <add>, %6, %cst_10 [1] : vector<8x64xf32> to vector<8xf32>
    %12 = vector.shape_cast %11 : vector<8xf32> to vector<8x1xf32>
    %13 = arith.addf %10, %12 : vector<8x1xf32>
    %c0_11 = arith.constant 0 : index
    %c0_12 = arith.constant 0 : index
    %14 = vector.load %arg6[%c0_11, %c0_12] : memref<8x1xf32, #tpu.memory_space<vmem>>, vector<8x1xf32>
    tpu.vector_store %arg6[%c0_11, %c0_12], %13 {strides = array<i32>} : memref<8x1xf32, #tpu.memory_space<vmem>>, vector<8x1xf32>,
    %c0_13 = arith.constant 0 : index
    %c0_14 = arith.constant 0 : index
    %15 = vector.load %arg7[%c0_13, %c0_14] : memref<8x1xf32, #tpu.memory_space<vmem>>, vector<8x1xf32>
    %16 = arith.mulf %6, %6 : vector<8x64xf32>
    %cst_15 = arith.constant dense<0.000000e+00> : vector<8xf32>
    %17 = vector.multi_reduction <add>, %16, %cst_15 [1] : vector<8x64xf32> to vector<8xf32>
    %18 = vector.shape_cast %17 : vector<8xf32> to vector<8x1xf32>
    %19 = arith.addf %15, %18 : vector<8x1xf32>
    %c0_16 = arith.constant 0 : index
    %c0_17 = arith.constant 0 : index
    %20 = vector.load %arg7[%c0_16, %c0_17] : memref<8x1xf32, #tpu.memory_space<vmem>>, vector<8x1xf32>
    tpu.vector_store %arg7[%c0_16, %c0_17], %19 {strides = array<i32>} : memref<8x1xf32, #tpu.memory_space<vmem>>, vector<8x1xf32>,
    %c0_i32_18 = arith.constant 0 : i32
    %21 = arith.cmpi eq, %arg2, %c0_i32_18 : i32
    %22 = arith.extui %21 : i1 to i32
    %c0_i32_19 = arith.constant 0 : i32
    %23 = arith.cmpi ne, %22, %c0_i32_19 : i32
    scf.if %23 {
      %c0_20 = arith.constant 0 : index
      %c0_21 = arith.constant 0 : index
      %24 = vector.load %arg6[%c0_20, %c0_21] : memref<8x1xf32, #tpu.memory_space<vmem>>, vector<8x1xf32>
      %cst_22 = arith.constant 1.562500e-02 : f32
      %25 = vector.broadcast %cst_22 : f32 to vector<8x1xf32>
      %26 = arith.mulf %24, %25 : vector<8x1xf32>
      %c0_23 = arith.constant 0 : index
      %c0_24 = arith.constant 0 : index
      %27 = vector.load %arg7[%c0_23, %c0_24] : memref<8x1xf32, #tpu.memory_space<vmem>>, vector<8x1xf32>
      %cst_25 = arith.constant 1.562500e-02 : f32
      %28 = vector.broadcast %cst_25 : f32 to vector<8x1xf32>
      %29 = arith.mulf %27, %28 : vector<8x1xf32>
      %30 = arith.mulf %26, %26 : vector<8x1xf32>
      %31 = arith.subf %29, %30 : vector<8x1xf32>
      %cst_26 = arith.constant 0.000000e+00 : f32
      %32 = vector.broadcast %cst_26 : f32 to vector<8x1xf32>
      %33 = arith.maximumf %31, %32 : vector<8x1xf32>
      %cst_27 = arith.constant 9.99999974E-6 : f32
      %34 = vector.broadcast %cst_27 : f32 to vector<8x1xf32>
      %35 = arith.addf %33, %34 : vector<8x1xf32>
      %36 = math.rsqrt %35 : vector<8x1xf32>
      %c0_28 = arith.constant 0 : index
      %c0_29 = arith.constant 0 : index
      %c0_30 = arith.constant 0 : index
      %37 = vector.load %arg5[%c0_28, %c0_29, %c0_30] : memref<1x8x64xf32, #tpu.memory_space<vmem>>, vector<1x8x64xf32>
      %38 = vector.shape_cast %37 : vector<1x8x64xf32> to vector<8x64xf32>
      %39 = vector.broadcast %26 : vector<8x1xf32> to vector<8x64xf32>
      %40 = arith.subf %38, %39 : vector<8x64xf32>
      %41 = vector.broadcast %36 : vector<8x1xf32> to vector<8x64xf32>
      %42 = arith.mulf %40, %41 : vector<8x64xf32>
      %cst_31 = arith.constant 0.000000e+00 : f32
      %43 = vector.broadcast %cst_31 : f32 to vector<8x64xf32>
      %44 = arith.maximumf %42, %43 : vector<8x64xf32>
      %c0_32 = arith.constant 0 : index
      %c0_33 = arith.constant 0 : index
      %c0_34 = arith.constant 0 : index
      %45 = vector.load %arg5[%c0_32, %c0_33, %c0_34] : memref<1x8x64xf32, #tpu.memory_space<vmem>>, vector<1x8x64xf32>
      %46 = vector.shape_cast %45 : vector<1x8x64xf32> to vector<8x64xf32>
      %47 = vector.shape_cast %44 : vector<8x64xf32> to vector<1x8x64xf32>
      tpu.vector_store %arg5[%c0_32, %c0_33, %c0_34], %47 {strides = array<i32>} : memref<1x8x64xf32, #tpu.memory_space<vmem>>, vector<1x8x64xf32>,
    } else {
    }
    return
  }
  func.func @transform_0(%arg0: i32, %arg1: i32, %arg2: i32) -> (i32, i32, i32) {
    %c0_i32 = arith.constant 0 : i32
    %c0_i32_0 = arith.constant 0 : i32
    return %arg0, %c0_i32, %arg2 : i32, i32, i32
  }
  func.func @transform_1(%arg0: i32, %arg1: i32, %arg2: i32) -> (i32, i32) {
    %c0_i32 = arith.constant 0 : i32
    %c0_i32_0 = arith.constant 0 : i32
    return %arg1, %c0_i32 : i32, i32
  }
  func.func @transform_2(%arg0: i32, %arg1: i32, %arg2: i32) -> (i32, i32, i32) {
    %c0_i32 = arith.constant 0 : i32
    %c0_i32_0 = arith.constant 0 : i32
    return %arg0, %arg1, %c0_i32 : i32, i32, i32
  }
}

</mosaic_0001>

<bundles_post_ra>
// kernel: contracting_block.1
= control target key start
LH: loop header
LB: loop body
LE: loop exit
PB: predicated region body
PF: predicated region fallthrough
CT: control target
= control target key end

     0   :  { %s518_s9 = smov 0   ;;  %s520_s10 = smov 0   ;;  %s567_s0 = inlined_call_operand.vmem [shape: bf16[2,36,64], index: 0, kind: input, shape index: {}]   ;;  %s568_s1 = inlined_call_operand.vmem [shape: bf16[8,36], index: 1, kind: input, shape index: {}]   ;;  %s569_s2 = inlined_call_operand.vmem [shape: f32[2,8,64], index: 2, kind: output, shape index: {}]  }
   0x1   :  { %s522_s11 = smov 0  }
   0x2 LB: > { %s31_s12 = sadd.s32 1, %s494_s10  ;;  %p418_p0 = scmp.ge.s32.totalorder %s498_s11, 1  ;;  %s498_s11 = sphi %s522_s11, %s12_s11   ;;  %s494_s10 = sphi %s520_s10, %s571_s10   ;;  %s490_s9 = sphi %s518_s9, %s570_s9  }
   0x3   : > { %p33_p1 = scmp.ge.s32.totalorder %s31_s12, 2  ;;  %p147_p2 = scmp.lt.s32.totalorder %s498_s11, 3 }
   0x5   : > { %s573_s12 = smov (%p33_p1, %s31_s12), 0  ;;  %p148_p3 = pnand %p418_p0, %p147_p2 }
   0x6   : > { %p178_p4 = scmp.lt.s32.totalorder (!%p148_p3), %s490_s9, 1 }
   0x7   : > { %151 = sbr.rel (%p148_p3) target bundleno = 526 (0x20e), region = 28 }
   0xc   : > { %v500_v0 = vmov 0.0   ;;  %vm501_vm0 = vmmov 0   ;;  %s575_s9 = smov (!%p178_p4, %s490_s9), 1  ;;  %vm230_vm1 = vcmask 1041408   ;;  %v205_v5 = vld [vmem:[%s568_s1] sm:$0xf] }
   0xd   : > { %431 = vmatprep.subr.bf16.mxu0 %v500_v0  ;;  %437 = vmatprep.mubr.msk.bf16.mxu0 %vm501_vm0, %v500_v0  ;;  %s441_s13 = smul.u32 20, %s575_s9  ;;  %vm226_vm2 = vcmask 293888   ;;  %vm202_vm3 = vcmask 7168   ;;  %s420_s19 = sshll.u32 %s575_s9, 3  ;;  %vm274_vm4 = vcmask 523264   ;;  %v502_v13 = vmov 0  }
   0xe   : > { %203 = vst.msk [vmem:[#allocation2] sm:$0xff] %vm202_vm3, %v500_v0  ;;  %204 = vst.msk [vmem:[#allocation3] sm:$0xff] %vm202_vm3, %v500_v0  ;;  %s547_s22 = scalar_lea.vmem %s569_s2, %s420_s19  ;;  %469 = vset.pattern.permute.xlu1 %v502_v13  ;;  %470 = vset.pattern.permute.xlu0 %v502_v13 }
   0xf   : > { %s185_s16 = scalar_lea.vmem %s567_s0, %s441_s13 }
  0x10   : > { %v471_v1 = vld [vmem:[%s185_s16 + $0x10] ss:$0 sps:$4 sm:$0x33]   ;;  %v472_v3 = vld [vmem:[%s185_s16 + $0x8] sm:$0xff]   ;;  %v473_v4 = vld [vmem:[%s185_s16] sm:$0xff]  }
  0x11   : > { %v232_v2 = vsel %vm230_vm1, %v471_v1, 0 }
  0x12   : > { %432 = vmatpush3.bf16.msra.mxu0 %v232_v2 }
  0x13   : > { %433 = vmatprep.subr.bf16.mxu0 %v500_v0 }
  0x15   : > { %v276_v14 = vld [vmem:[#allocation2] sm:$0xff]  ;;  %v283_v17 = vld [vmem:[#allocation3] sm:$0xff] }
  0x16   : > { %434 = vmatpush3.bf16.msra.mxu0 %v472_v3 }
  0x17   : > { %435 = vmatprep.subr.bf16.mxu0 %v500_v0 }
  0x1a   : > { %436 = vmatpush3.bf16.msra.mxu0 %v473_v4 }
  0x1d   : > { %438 = vmatmul.mubr.msk.bf16.vlgmr.msra.gmra.mxu0 %vm226_vm2, %v205_v5 }
  0xdd   : > { %v268_v6 = vpop.f32.mrf.mxu0 }
  0xde   : > { %275 = vst.msk [vmem:[%s547_s22] sm:$0xff] %vm274_vm4, %v268_v6  ;;  %v277_v7 = vsel %vm274_vm4, %v268_v6, 0.0  ;;  %v284_v8 = vmul.f32 %v268_v6, %v268_v6 }
  0xdf   : > { %278 = vadd.xlane.f32.xlu0 %v277_v7  ;;  %v439_v9 = vpop.f32.mrf.mxu0 }
  0xe0   : > { %v285_v11 = vsel %vm274_vm4, %v284_v8, 0.0 }
  0xe1   : > { %v271_v10 = vpop.f32.mrf.mxu0 }
  0xe3   : > { %286 = vadd.xlane.f32.xlu0 %v285_v11  ;;  %v440_v12 = vpop.f32.mrf.mxu0 }
  0xe5   : > { %v302_v30 = vld [vmem:[%s547_s22] sm:$0xff] }
 0x168   : > { %v279_v15 = vpop.xlane.xlu0 %278 }
 0x169   : > { %v280_v16 = vadd.f32 %v279_v15, %v276_v14 }
 0x16b   : > { %282 = vst.msk [vmem:[#allocation2] sm:$0xff] %vm202_vm3, %v280_v16 }
 0x16c   : > { %v287_v18 = vpop.xlane.xlu0 %286 }
 0x16d   : > { %v288_v19 = vadd.f32 %v287_v18, %v283_v17 }
 0x16f   : > { %289 = vst.msk [vmem:[#allocation3] sm:$0xff] %vm202_vm3, %v288_v19 }
 0x172   : > { %v293_v20 = vld [vmem:[#allocation2] sm:$0xff] }
 0x173   : > { %v294_v21 = vmul.f32 0.015625, %v293_v20 }
 0x175   : > { %305 = vperm.xlu1 %469, %v294_v21   ;;  %v297_v24 = vmul.f32 %v294_v21, %v294_v21 }
 0x176   : > { %v295_v22 = vld [vmem:[#allocation3] sm:$0xff] }
 0x177   : > { %v296_v23 = vmul.f32 0.015625, %v295_v22 }
 0x179   : > { %v298_v25 = vsub.f32 %v296_v23, %v297_v24 }
 0x17b   : > { %v299_v26 = vmax.f32 %v298_v25, 0.0 }
 0x17d   : > { %v300_v27 = vadd.f32 1e-05, %v299_v26 }
 0x17f   : > { %474 = vrsqrt.f32 %v300_v27 }
 0x18c   : > { %v475_v28 = vpop.eup %474 }
 0x18d   : > { %311 = vperm.xlu1 %469, %v475_v28  }
 0x1f0   : > { %v306_v29 = vpop.permute.xlu1 %305 }
 0x1f1   : > { %v308_v31 = vsub.f32 %v302_v30, %v306_v29 }
 0x208   : > { %v312_v32 = vpop.permute.xlu1 %311 }
 0x209   : > { %v314_v33 = vmul.f32 %v312_v32, %v308_v31 }
 0x20b   : > { %v315_v34 = vmax.f32 %v314_v33, 0.0 }
 0x20d   : > { %316 = vst.msk [vmem:[%s547_s22] sm:$0xff] %vm274_vm4, %v315_v34 }
 0x20e PF: > { %s12_s11 = sadd.s32 1, %s498_s11   ;;  %s570_s9 = smov %s494_s10 }
 0x20f   : > { %p9_p5 = scmp.ge.s32.totalorder %s12_s11, 4   ;;  %s571_s10 = smov %s573_s12 }
 0x211   :  { %11 = sbr.rel (!%p9_p5) target bundleno = 2 (0x2), region = 69 }

</bundles_post_ra>
